<compile_context>
chip_gen: v7x
topology: tpu7x:2x2x1
jax: 0.10.0
libtpu: 0.0.40
codegen_flags: <defaults>
</compile_context>

<pallas_src>
import jax
import jax.numpy as jnp
from jax.experimental import pallas as pl
from jax.experimental.pallas import tpu as pltpu


def _round_up(v, m):
    return (v + m - 1) // m * m


def rnn_kernel(x_ref, wi_t_ref, wh_t_ref, bh_ref, out_ref, h_ref, p_ref):
    """One time-chunk of the recurrence.

    x_ref   : (Tc*Bp, I)    flattened input chunk (time-major rows)
    wi_t_ref: (I, Hp)       Wi^T, hidden padded lane-dense
    wh_t_ref: (Hp, Hp)      Wh^T
    bh_ref  : (1, Hp)       recurrent bias
    out_ref : (Tc, Bp, Hp)  hidden states of this chunk
    h_ref   : (Bp, Hp)      VMEM scratch: hidden state carried across chunks
    p_ref   : (Tc*Bp, Hp)   VMEM scratch: per-chunk input projection
    """
    tc, bp, hp = out_ref.shape

    # h_0 = 0 only before the very first chunk; afterwards h is carried in VMEM.
    @pl.when(pl.program_id(0) == 0)
    def _():
        h_ref[...] = jnp.zeros_like(h_ref)

    # One batched MXU matmul for the whole chunk's input projection (off the
    # serial chain); the (1, Hp) bias broadcast is added exactly once here.
    p_ref[...] = (
        jnp.dot(x_ref[...], wi_t_ref[...], preferred_element_type=jnp.float32)
        + bh_ref[...]
    )

    # Loop-invariant MXU RHS: loaded once, push hoisted out of the unroll.
    wh_t = wh_t_ref[...]

    # Serial recurrence, statically unrolled (tc is a small static chunk size).
    # Each p slice is an 8-sublane-aligned VMEM view; each store is a full
    # (8,128) unmasked vst.
    h = h_ref[...]
    for t in range(tc):
        p_t = p_ref[pl.ds(t * bp, bp), :]
        h = jnp.tanh(p_t + jnp.dot(h, wh_t, preferred_element_type=jnp.float32))
        out_ref[t] = h
    h_ref[...] = h


def rnn_forward(x, wi, wh, bh, *, chunk_t=None):
    """x: (T, B, I); wi: (H, I); wh: (H, H); bh: (H,).  Returns (T, B, H) f32."""
    T, B, I = x.shape
    H = wi.shape[0]

    Bp = _round_up(max(B, 8), 8)        # sublane-dense batch
    Hp = _round_up(max(H, 128), 128)    # lane-dense hidden

    if chunk_t is None:
        chunk_t = min(T, 16)            # small static unroll per chunk
    Tp = _round_up(T, chunk_t)
    n_chunks = Tp // chunk_t

    # Zero-pad batch / time and pre-flatten (time, batch) -> rows so the kernel
    # needs no reshape.  Padded rows / trailing padded steps produce isolated
    # garbage which is sliced off below (the recurrence is row-independent and
    # padded steps come after all real ones).
    x_p = jnp.zeros((Tp, Bp, I), jnp.float32).at[:T, :B, :].set(
        x.astype(jnp.float32))
    x2d = x_p.reshape(Tp * Bp, I)

    # nn.Linear computes x @ W^T -> pre-transpose; zero-pad the hidden dim.
    # Padded hidden columns stay exactly 0 through tanh (zero weights / bias).
    wi_t = jnp.zeros((I, Hp), jnp.float32).at[:, :H].set(wi.T)
    wh_t = jnp.zeros((Hp, Hp), jnp.float32).at[:H, :H].set(wh.T)
    bh2 = jnp.zeros((1, Hp), jnp.float32).at[0, :H].set(bh)

    # Explicit VMEM budget with headroom (clamped to v7x's 64 MiB physical).
    f32 = 4
    bytes_x_chunk = chunk_t * Bp * _round_up(I, 128) * f32
    bytes_out_chunk = chunk_t * Bp * Hp * f32
    bytes_weights = (_round_up(I, 8) * Hp + Hp * Hp + 8 * Hp) * f32
    bytes_scratch = (Bp * Hp + chunk_t * Bp * Hp) * f32
    vmem_limit = 4 * (bytes_x_chunk + bytes_out_chunk + bytes_weights) + bytes_scratch
    vmem_limit = int(min(max(vmem_limit, 16 << 20), 64 << 20))

    grid_spec = pltpu.PrefetchScalarGridSpec(
        num_scalar_prefetch=0,
        grid=(n_chunks,),
        in_specs=[
            pl.BlockSpec((chunk_t * Bp, I), lambda i: (i, 0)),   # x chunk
            pl.BlockSpec((I, Hp), lambda i: (0, 0)),             # Wi^T
            pl.BlockSpec((Hp, Hp), lambda i: (0, 0)),            # Wh^T
            pl.BlockSpec((1, Hp), lambda i: (0, 0)),             # b_h
        ],
        out_specs=pl.BlockSpec((chunk_t, Bp, Hp), lambda i: (i, 0, 0)),
        scratch_shapes=[
            pltpu.VMEM((Bp, Hp), jnp.float32),            # carried hidden state
            pltpu.VMEM((chunk_t * Bp, Hp), jnp.float32),  # chunk input projection
        ],
    )

    out_padded = pl.pallas_call(
        rnn_kernel,
        out_shape=jax.ShapeDtypeStruct((Tp, Bp, Hp), jnp.float32),
        grid_spec=grid_spec,
        compiler_params=pltpu.CompilerParams(
            # The time-chunk axis carries the recurrence -> must be 'arbitrary'.
            dimension_semantics=("arbitrary",),
            vmem_limit_bytes=vmem_limit,
        ),
    )(x2d, wi_t, wh_t, bh2)

    return out_padded[:T, :B, :H]


def rnn_reference(x, wi, wh, bh):
    """Pure-JAX reference mirroring the PyTorch loop."""
    T, B, _ = x.shape
    H = wi.shape[0]
    h = jnp.zeros((B, H), jnp.float32)
    outs = []
    for t in range(T):
        h = jnp.tanh(x[t] @ wi.T + h @ wh.T + bh)
        outs.append(h)
    return jnp.stack(outs, axis=0)


if __name__ == "__main__":
    # Small shapes consistent with the module: seq=8, batch=2, input=4, hidden=32.
    T, B, I, H = 8, 2, 4, 32
    key = jax.random.PRNGKey(0)
    kx, kwi, kwh, kbh = jax.random.split(key, 4)

    x = jax.random.normal(kx, (T, B, I), dtype=jnp.float32)
    # Parameter shapes per nn.Linear: weight is (out, in). wi has no bias.
    wi = jax.random.normal(kwi, (H, I), dtype=jnp.float32) * 0.1
    wh = jax.random.normal(kwh, (H, H), dtype=jnp.float32) * 0.1
    bh = jax.random.normal(kbh, (H,), dtype=jnp.float32) * 0.1

    # NOTE: forward() never calls decode(); the wd / ReLU head is intentionally
    # not part of this kernel.

    ref = rnn_reference(x, wi, wh, bh)

    # Single-chunk path (whole sequence handled in one grid step).
    out1 = jax.block_until_ready(rnn_forward(x, wi, wh, bh))
    # Multi-chunk path (exercises the VMEM-carried hidden state across chunks).
    out2 = jax.block_until_ready(rnn_forward(x, wi, wh, bh, chunk_t=4))

    assert out1.shape == (T, B, H)
    assert out2.shape == (T, B, H)
    assert jnp.allclose(out1, ref, atol=1e-5, rtol=1e-5), "mismatch (single chunk)"
    assert jnp.allclose(out2, ref, atol=1e-5, rtol=1e-5), "mismatch (multi chunk)"

    print("KERNEL_OK")
</pallas_src>

<mosaic_0001>
module attributes {stable_mosaic.version = 11 : i64} {
  func.func @rnn_kernel(%arg0: i32, %arg1: memref<64x4xf32, #tpu.memory_space<vmem>>, %arg2: memref<4x128xf32, #tpu.memory_space<vmem>>, %arg3: memref<128x128xf32, #tpu.memory_space<vmem>>, %arg4: memref<1x128xf32, #tpu.memory_space<vmem>>, %arg5: memref<8x8x128xf32, #tpu.memory_space<vmem>>, %arg6: memref<8x128xf32, #tpu.memory_space<vmem>>, %arg7: memref<64x128xf32, #tpu.memory_space<vmem>>) attributes {dimension_semantics = [#tpu.dimension_semantics<arbitrary>], iteration_bounds = array<i64: 1>, scalar_prefetch = 0 : i64, scratch_operands = 2 : i64, tpu.core_type = #tpu.core_type<tc>, window_params = [{transform_indices = @transform_0, window_bounds = array<i64: 64, 4>}, {pipeline_mode = #tpu.pipeline_mode<synchronous>, transform_indices = @transform_1, window_bounds = array<i64: 4, 128>}, {pipeline_mode = #tpu.pipeline_mode<synchronous>, transform_indices = @transform_2, window_bounds = array<i64: 128, 128>}, {pipeline_mode = #tpu.pipeline_mode<synchronous>, transform_indices = @transform_3, window_bounds = array<i64: 1, 128>}, {transform_indices = @transform_4, window_bounds = array<i64: 8, 8, 128>}]} {
    %c0_i32 = arith.constant 0 : i32
    %0 = arith.cmpi eq, %arg0, %c0_i32 : i32
    %1 = arith.extui %0 : i1 to i32
    %c0_i32_0 = arith.constant 0 : i32
    %2 = arith.cmpi ne, %1, %c0_i32_0 : i32
    scf.if %2 {
      %cst_48 = arith.constant 0.000000e+00 : f32
      %69 = vector.broadcast %cst_48 : f32 to vector<8x128xf32>
      %c0_49 = arith.constant 0 : index
      %c0_50 = arith.constant 0 : index
      %70 = vector.load %arg6[%c0_49, %c0_50] : memref<8x128xf32, #tpu.memory_space<vmem>>, vector<8x128xf32>
      tpu.vector_store %arg6[%c0_49, %c0_50], %69 {strides = array<i32>} : memref<8x128xf32, #tpu.memory_space<vmem>>, vector<8x128xf32>,
    } else {
    }
    %c0 = arith.constant 0 : index
    %c0_1 = arith.constant 0 : index
    %3 = vector.load %arg1[%c0, %c0_1] : memref<64x4xf32, #tpu.memory_space<vmem>>, vector<64x4xf32>
    %c0_2 = arith.constant 0 : index
    %c0_3 = arith.constant 0 : index
    %4 = vector.load %arg2[%c0_2, %c0_3] : memref<4x128xf32, #tpu.memory_space<vmem>>, vector<4x128xf32>
    %cst = arith.constant dense<0.000000e+00> : vector<64x128xf32>
    %5 = tpu.matmul %3, %4, %cst {dimension_numbers = #tpu.dot_dimension_numbers<[1], [0], [0], [1], [0, 0, 1, 1], [], []>} : vector<64x4xf32>, vector<4x128xf32>, vector<64x128xf32> -> vector<64x128xf32>
    %c0_4 = arith.constant 0 : index
    %c0_5 = arith.constant 0 : index
    %6 = vector.load %arg4[%c0_4, %c0_5] : memref<1x128xf32, #tpu.memory_space<vmem>>, vector<1x128xf32>
    %7 = vector.broadcast %6 : vector<1x128xf32> to vector<64x128xf32>
    %8 = arith.addf %5, %7 : vector<64x128xf32>
    %c0_6 = arith.constant 0 : index
    %c0_7 = arith.constant 0 : index
    %9 = vector.load %arg7[%c0_6, %c0_7] : memref<64x128xf32, #tpu.memory_space<vmem>>, vector<64x128xf32>
    tpu.vector_store %arg7[%c0_6, %c0_7], %8 {strides = array<i32>} : memref<64x128xf32, #tpu.memory_space<vmem>>, vector<64x128xf32>,
    %c0_8 = arith.constant 0 : index
    %c0_9 = arith.constant 0 : index
    %10 = vector.load %arg3[%c0_8, %c0_9] : memref<128x128xf32, #tpu.memory_space<vmem>>, vector<128x128xf32>
    %c0_10 = arith.constant 0 : index
    %c0_11 = arith.constant 0 : index
    %11 = vector.load %arg6[%c0_10, %c0_11] : memref<8x128xf32, #tpu.memory_space<vmem>>, vector<8x128xf32>
    %c0_12 = arith.constant 0 : index
    %c0_13 = arith.constant 0 : index
    %12 = vector.load %arg7[%c0_12, %c0_13] : memref<64x128xf32, #tpu.memory_space<vmem>>, vector<8x128xf32>
    %cst_14 = arith.constant dense<0.000000e+00> : vector<8x128xf32>
    %13 = tpu.matmul %11, %10, %cst_14 {dimension_numbers = #tpu.dot_dimension_numbers<[1], [0], [0], [1], [0, 0, 1, 1], [], []>} : vector<8x128xf32>, vector<128x128xf32>, vector<8x128xf32> -> vector<8x128xf32>
    %14 = arith.addf %12, %13 : vector<8x128xf32>
    %15 = math.tanh %14 : vector<8x128xf32>
    %c0_15 = arith.constant 0 : index
    %c0_16 = arith.constant 0 : index
    %c0_17 = arith.constant 0 : index
    %16 = vector.load %arg5[%c0_15, %c0_16, %c0_17] : memref<8x8x128xf32, #tpu.memory_space<vmem>>, vector<1x8x128xf32>
    %17 = vector.shape_cast %16 : vector<1x8x128xf32> to vector<8x128xf32>
    %18 = vector.shape_cast %15 : vector<8x128xf32> to vector<1x8x128xf32>
    tpu.vector_store %arg5[%c0_15, %c0_16, %c0_17], %18 {strides = array<i32>} : memref<8x8x128xf32, #tpu.memory_space<vmem>>, vector<1x8x128xf32>,
    %c8 = arith.constant 8 : index
    %c0_18 = arith.constant 0 : index
    %19 = vector.load %arg7[%c8, %c0_18] : memref<64x128xf32, #tpu.memory_space<vmem>>, vector<8x128xf32>
    %cst_19 = arith.constant dense<0.000000e+00> : vector<8x128xf32>
    %20 = tpu.matmul %15, %10, %cst_19 {dimension_numbers = #tpu.dot_dimension_numbers<[1], [0], [0], [1], [0, 0, 1, 1], [], []>} : vector<8x128xf32>, vector<128x128xf32>, vector<8x128xf32> -> vector<8x128xf32>
    %21 = arith.addf %19, %20 : vector<8x128xf32>
    %22 = math.tanh %21 : vector<8x128xf32>
    %c1 = arith.constant 1 : index
    %c0_20 = arith.constant 0 : index
    %c0_21 = arith.constant 0 : index
    %23 = vector.load %arg5[%c1, %c0_20, %c0_21] : memref<8x8x128xf32, #tpu.memory_space<vmem>>, vector<1x8x128xf32>
    %24 = vector.shape_cast %23 : vector<1x8x128xf32> to vector<8x128xf32>
    %25 = vector.shape_cast %22 : vector<8x128xf32> to vector<1x8x128xf32>
    tpu.vector_store %arg5[%c1, %c0_20, %c0_21], %25 {strides = array<i32>} : memref<8x8x128xf32, #tpu.memory_space<vmem>>, vector<1x8x128xf32>,
    %c16 = arith.constant 16 : index
    %c0_22 = arith.constant 0 : index
    %26 = vector.load %arg7[%c16, %c0_22] : memref<64x128xf32, #tpu.memory_space<vmem>>, vector<8x128xf32>
    %cst_23 = arith.constant dense<0.000000e+00> : vector<8x128xf32>
    %27 = tpu.matmul %22, %10, %cst_23 {dimension_numbers = #tpu.dot_dimension_numbers<[1], [0], [0], [1], [0, 0, 1, 1], [], []>} : vector<8x128xf32>, vector<128x128xf32>, vector<8x128xf32> -> vector<8x128xf32>
    %28 = arith.addf %26, %27 : vector<8x128xf32>
    %29 = math.tanh %28 : vector<8x128xf32>
    %c2 = arith.constant 2 : index
    %c0_24 = arith.constant 0 : index
    %c0_25 = arith.constant 0 : index
    %30 = vector.load %arg5[%c2, %c0_24, %c0_25] : memref<8x8x128xf32, #tpu.memory_space<vmem>>, vector<1x8x128xf32>
    %31 = vector.shape_cast %30 : vector<1x8x128xf32> to vector<8x128xf32>
    %32 = vector.shape_cast %29 : vector<8x128xf32> to vector<1x8x128xf32>
    tpu.vector_store %arg5[%c2, %c0_24, %c0_25], %32 {strides = array<i32>} : memref<8x8x128xf32, #tpu.memory_space<vmem>>, vector<1x8x128xf32>,
    %c24 = arith.constant 24 : index
    %c0_26 = arith.constant 0 : index
    %33 = vector.load %arg7[%c24, %c0_26] : memref<64x128xf32, #tpu.memory_space<vmem>>, vector<8x128xf32>
    %cst_27 = arith.constant dense<0.000000e+00> : vector<8x128xf32>
    %34 = tpu.matmul %29, %10, %cst_27 {dimension_numbers = #tpu.dot_dimension_numbers<[1], [0], [0], [1], [0, 0, 1, 1], [], []>} : vector<8x128xf32>, vector<128x128xf32>, vector<8x128xf32> -> vector<8x128xf32>
    %35 = arith.addf %33, %34 : vector<8x128xf32>
    %36 = math.tanh %35 : vector<8x128xf32>
    %c3 = arith.constant 3 : index
    %c0_28 = arith.constant 0 : index
    %c0_29 = arith.constant 0 : index
    %37 = vector.load %arg5[%c3, %c0_28, %c0_29] : memref<8x8x128xf32, #tpu.memory_space<vmem>>, vector<1x8x128xf32>
    %38 = vector.shape_cast %37 : vector<1x8x128xf32> to vector<8x128xf32>
    %39 = vector.shape_cast %36 : vector<8x128xf32> to vector<1x8x128xf32>
    tpu.vector_store %arg5[%c3, %c0_28, %c0_29], %39 {strides = array<i32>} : memref<8x8x128xf32, #tpu.memory_space<vmem>>, vector<1x8x128xf32>,
    %c32 = arith.constant 32 : index
    %c0_30 = arith.constant 0 : index
    %40 = vector.load %arg7[%c32, %c0_30] : memref<64x128xf32, #tpu.memory_space<vmem>>, vector<8x128xf32>
    %cst_31 = arith.constant dense<0.000000e+00> : vector<8x128xf32>
    %41 = tpu.matmul %36, %10, %cst_31 {dimension_numbers = #tpu.dot_dimension_numbers<[1], [0], [0], [1], [0, 0, 1, 1], [], []>} : vector<8x128xf32>, vector<128x128xf32>, vector<8x128xf32> -> vector<8x128xf32>
    %42 = arith.addf %40, %41 : vector<8x128xf32>
    %43 = math.tanh %42 : vector<8x128xf32>
    %c4 = arith.constant 4 : index
    %c0_32 = arith.constant 0 : index
    %c0_33 = arith.constant 0 : index
    %44 = vector.load %arg5[%c4, %c0_32, %c0_33] : memref<8x8x128xf32, #tpu.memory_space<vmem>>, vector<1x8x128xf32>
    %45 = vector.shape_cast %44 : vector<1x8x128xf32> to vector<8x128xf32>
    %46 = vector.shape_cast %43 : vector<8x128xf32> to vector<1x8x128xf32>
    tpu.vector_store %arg5[%c4, %c0_32, %c0_33], %46 {strides = array<i32>} : memref<8x8x128xf32, #tpu.memory_space<vmem>>, vector<1x8x128xf32>,
    %c40 = arith.constant 40 : index
    %c0_34 = arith.constant 0 : index
    %47 = vector.load %arg7[%c40, %c0_34] : memref<64x128xf32, #tpu.memory_space<vmem>>, vector<8x128xf32>
    %cst_35 = arith.constant dense<0.000000e+00> : vector<8x128xf32>
    %48 = tpu.matmul %43, %10, %cst_35 {dimension_numbers = #tpu.dot_dimension_numbers<[1], [0], [0], [1], [0, 0, 1, 1], [], []>} : vector<8x128xf32>, vector<128x128xf32>, vector<8x128xf32> -> vector<8x128xf32>
    %49 = arith.addf %47, %48 : vector<8x128xf32>
    %50 = math.tanh %49 : vector<8x128xf32>
    %c5 = arith.constant 5 : index
    %c0_36 = arith.constant 0 : index
    %c0_37 = arith.constant 0 : index
    %51 = vector.load %arg5[%c5, %c0_36, %c0_37] : memref<8x8x128xf32, #tpu.memory_space<vmem>>, vector<1x8x128xf32>
    %52 = vector.shape_cast %51 : vector<1x8x128xf32> to vector<8x128xf32>
    %53 = vector.shape_cast %50 : vector<8x128xf32> to vector<1x8x128xf32>
    tpu.vector_store %arg5[%c5, %c0_36, %c0_37], %53 {strides = array<i32>} : memref<8x8x128xf32, #tpu.memory_space<vmem>>, vector<1x8x128xf32>,
    %c48 = arith.constant 48 : index
    %c0_38 = arith.constant 0 : index
    %54 = vector.load %arg7[%c48, %c0_38] : memref<64x128xf32, #tpu.memory_space<vmem>>, vector<8x128xf32>
    %cst_39 = arith.constant dense<0.000000e+00> : vector<8x128xf32>
    %55 = tpu.matmul %50, %10, %cst_39 {dimension_numbers = #tpu.dot_dimension_numbers<[1], [0], [0], [1], [0, 0, 1, 1], [], []>} : vector<8x128xf32>, vector<128x128xf32>, vector<8x128xf32> -> vector<8x128xf32>
    %56 = arith.addf %54, %55 : vector<8x128xf32>
    %57 = math.tanh %56 : vector<8x128xf32>
    %c6 = arith.constant 6 : index
    %c0_40 = arith.constant 0 : index
    %c0_41 = arith.constant 0 : index
    %58 = vector.load %arg5[%c6, %c0_40, %c0_41] : memref<8x8x128xf32, #tpu.memory_space<vmem>>, vector<1x8x128xf32>
    %59 = vector.shape_cast %58 : vector<1x8x128xf32> to vector<8x128xf32>
    %60 = vector.shape_cast %57 : vector<8x128xf32> to vector<1x8x128xf32>
    tpu.vector_store %arg5[%c6, %c0_40, %c0_41], %60 {strides = array<i32>} : memref<8x8x128xf32, #tpu.memory_space<vmem>>, vector<1x8x128xf32>,
    %c56 = arith.constant 56 : index
    %c0_42 = arith.constant 0 : index
    %61 = vector.load %arg7[%c56, %c0_42] : memref<64x128xf32, #tpu.memory_space<vmem>>, vector<8x128xf32>
    %cst_43 = arith.constant dense<0.000000e+00> : vector<8x128xf32>
    %62 = tpu.matmul %57, %10, %cst_43 {dimension_numbers = #tpu.dot_dimension_numbers<[1], [0], [0], [1], [0, 0, 1, 1], [], []>} : vector<8x128xf32>, vector<128x128xf32>, vector<8x128xf32> -> vector<8x128xf32>
    %63 = arith.addf %61, %62 : vector<8x128xf32>
    %64 = math.tanh %63 : vector<8x128xf32>
    %c7 = arith.constant 7 : index
    %c0_44 = arith.constant 0 : index
    %c0_45 = arith.constant 0 : index
    %65 = vector.load %arg5[%c7, %c0_44, %c0_45] : memref<8x8x128xf32, #tpu.memory_space<vmem>>, vector<1x8x128xf32>
    %66 = vector.shape_cast %65 : vector<1x8x128xf32> to vector<8x128xf32>
    %67 = vector.shape_cast %64 : vector<8x128xf32> to vector<1x8x128xf32>
    tpu.vector_store %arg5[%c7, %c0_44, %c0_45], %67 {strides = array<i32>} : memref<8x8x128xf32, #tpu.memory_space<vmem>>, vector<1x8x128xf32>,
    %c0_46 = arith.constant 0 : index
    %c0_47 = arith.constant 0 : index
    %68 = vector.load %arg6[%c0_46, %c0_47] : memref<8x128xf32, #tpu.memory_space<vmem>>, vector<8x128xf32>
    tpu.vector_store %arg6[%c0_46, %c0_47], %64 {strides = array<i32>} : memref<8x128xf32, #tpu.memory_space<vmem>>, vector<8x128xf32>,
    return
  }
  func.func @transform_0(%arg0: i32) -> (i32, i32) {
    %c0_i32 = arith.constant 0 : i32
    %c0_i32_0 = arith.constant 0 : i32
    return %arg0, %c0_i32 : i32, i32
  }
  func.func @transform_1(%arg0: i32) -> (i32, i32) {
    %c0_i32 = arith.constant 0 : i32
    %c0_i32_0 = arith.constant 0 : i32
    %c0_i32_1 = arith.constant 0 : i32
    return %c0_i32, %c0_i32_0 : i32, i32
  }
  func.func @transform_2(%arg0: i32) -> (i32, i32) {
    %c0_i32 = arith.constant 0 : i32
    %c0_i32_0 = arith.constant 0 : i32
    %c0_i32_1 = arith.constant 0 : i32
    return %c0_i32, %c0_i32_0 : i32, i32
  }
  func.func @transform_3(%arg0: i32) -> (i32, i32) {
    %c0_i32 = arith.constant 0 : i32
    %c0_i32_0 = arith.constant 0 : i32
    %c0_i32_1 = arith.constant 0 : i32
    return %c0_i32, %c0_i32_0 : i32, i32
  }
  func.func @transform_4(%arg0: i32) -> (i32, i32, i32) {
    %c0_i32 = arith.constant 0 : i32
    %c0_i32_0 = arith.constant 0 : i32
    %c0_i32_1 = arith.constant 0 : i32
    return %arg0, %c0_i32, %c0_i32_0 : i32, i32, i32
  }
}

</mosaic_0001>

<bundles_post_ra>
// kernel: tpu_custom_call.1
= control target key start
LH: loop header
LB: loop body
LE: loop exit
PB: predicated region body
PF: predicated region fallthrough
CT: control target
= control target key end

     0   :  { %9 = vsyncpa [#allocation5], 0  ;;  %s1824_s0 = inlined_call_operand.vmem [shape: f32[64,4], index: 0, kind: input, shape index: {}]   ;;  %s1825_s1 = inlined_call_operand.vmem [shape: f32[4,128], index: 1, kind: input, shape index: {}]   ;;  %s1826_s2 = inlined_call_operand.hbm [shape: f32[128,128], index: 2, kind: input, shape index: {}]   ;;  %s1827_s3 = inlined_call_operand.vmem [shape: f32[1,128], index: 3, kind: input, shape index: {}]   ;;  %s1828_s4 = inlined_call_operand.hbm [shape: f32[8,8,128], index: 4, kind: output, shape index: {}]  }
   0x1   :  { %10 = vsyncpa [#allocation6], 0  ;;  %s1541_s15 = smov [#allocation4]   ;;  %s1493_s19 = scalar_lea.hbm %s1826_s2, 2048 }
   0x2   :  { %s20_s16 = sshll.u32 %s1541_s15, 4  ;;  %p1494_p0 = scmp.ne.s32.totalorder %s1826_s2, %s1493_s19  ;;  %s21_s16 = int_to_ptr.vmem [resolvable:$true] %s20_s16 }
   0x3   :  { %p1497_p1 = scmp.lt.u32.totalorder %s1493_s19, %s1826_s2 }
   0x5   :  { %p1499_p2 = pnand %p1497_p1, %p1494_p0 }
   0x7   :  { %1502 = shalt.err (!%p1499_p2)
}
   0x8   :  { %s1503_s24 = scalar_lea.vmem %s21_s16, 2048  ;;  %p1508_p4 = scmp.lt.s32.totalorder %s21_s16, %s21_s16 }
   0x9   :  { %p1504_p3 = scmp.ne.s32.totalorder %s21_s16, %s1503_s24  ;;  %p1509_p5 = scmp.lt.s32.totalorder %s1503_s24, %s1503_s24 }
   0xb   :  { %p1510_p6 = por %p1509_p5, %p1508_p4 }
   0xd   :  { %p1511_p7 = pnand %p1510_p6, %p1504_p3 }
   0xf   :  { %1514 = shalt.err (!%p1511_p7)
}
  0x10   :  { %s1542_s25 = smov 128   ;;  %s1543_s26 = smov 8  }
  0x11   :  { %26 = dma.hbm_to_vmem [thread:$0]  %s1826_s2, 2048, %s21_s16, [#allocation5], %s1542_s25, %s1542_s25, %s1543_s26  }
  0x12   :  { %1537 = dma.done.wait [#allocation5], 2048  }
  0x13   :  { %1538 = vsyncadd [#allocation5], 4294965248  ;;  %v1544_v0 = vmov 0.0|0.0   ;;  %vm1545_vm0 = vmmov 0   ;;  %v1546_v1 = vmov 0.0   ;;  %v195_v2 = vld [vmem:[#allocation4] sm:$0xff] }
  0x14   :  { %1278 = vmatprep.subr.bf16.mxu1 %v1544_v0  ;;  %1030 = vmatprep.mubr.msk.f32.mxu1 %vm1545_vm0, %v1546_v1  ;;  %v196_v3 = vld [vmem:[#allocation4 + $0x8] sm:$0xff]  ;;  %v197_v4 = vld [vmem:[#allocation4 + $0x10] sm:$0xff]  ;;  %v198_v6 = vld [vmem:[#allocation4 + $0x18] sm:$0xff]  ;;  %vm78_vm1 = vcmask 1043456   ;;  %vm53_vm2 = vcmask 31744  }
  0x15   :  { %v1591_v5 = vpack.c.bf16 %v196_v3, %v195_v2  ;;  %v1594_v7 = vpack.c.bf16 %v198_v6, %v197_v4  ;;  %v199_v8 = vld [vmem:[#allocation4 + $0x20] sm:$0xff]  ;;  %v200_v9 = vld [vmem:[#allocation4 + $0x28] sm:$0xff]  ;;  %v45_v10 = vld [vmem:[%s1825_s1] sm:$0xf] }
  0x16   :  { %984 = vmatprep.subr.msk.mxu0 %vm78_vm1, %v45_v10  ;;  %v37_v11 = vld [vmem:[%s1824_s0] sm:$0xff]  ;;  %v38_v12 = vld [vmem:[%s1824_s0 + $0x8] sm:$0xff]  ;;  %v1608_v13 = vpack.c.bf16 %v200_v9, %v199_v8  ;;  %v201_v14 = vld [vmem:[#allocation4 + $0x30] sm:$0xff] }
  0x17   :  { %1280 = vmatpush3.bf16.msra.mxu1 %v1591_v5  ;;  %985 = vmatpush3.msk.msra.mxu0 %vm78_vm1, %v45_v10  ;;  %v202_v15 = vld [vmem:[#allocation4 + $0x38] sm:$0xff]  ;;  %v203_v17 = vld [vmem:[#allocation4 + $0x40] sm:$0xff]  ;;  %v204_v18 = vld [vmem:[#allocation4 + $0x48] sm:$0xff] }
  0x18   :  { %1281 = vmatprep.subr.bf16.mxu1 %v1544_v0  ;;  %986 = vmatprep.mubr.msk.f32.mxu0 %vm53_vm2, %v37_v11  ;;  %v1616_v16 = vpack.c.bf16 %v202_v15, %v201_v14  ;;  %v1622_v19 = vpack.c.bf16 %v204_v18, %v203_v17  ;;  %v205_v20 = vld [vmem:[#allocation4 + $0x50] sm:$0xff]  ;;  %v206_v21 = vld [vmem:[#allocation4 + $0x58] sm:$0xff]  ;;  %v207_v23 = vld [vmem:[#allocation4 + $0x60] sm:$0xff] }
  0x19   :  { %987 = vmatmul.mubr.msk.f32.vlgmr.msra.gmra.mrb[0].mxu0 %vm53_vm2, %v38_v12  ;;  %1302 = vmatprep.subr.bf16.mxu0 %v1544_v0  ;;  %v1628_v22 = vpack.c.bf16 %v206_v21, %v205_v20  ;;  %v208_v24 = vld [vmem:[#allocation4 + $0x68] sm:$0xff]  ;;  %v209_v26 = vld [vmem:[#allocation4 + $0x70] sm:$0xff]  ;;  %v210_v27 = vld [vmem:[#allocation4 + $0x78] sm:$0xff] }
  0x1a   :  { %1304 = vmatpush3.bf16.msra.mxu0 %v1591_v5  ;;  %v1634_v25 = vpack.c.bf16 %v208_v24, %v207_v23  ;;  %v1640_v28 = vpack.c.bf16 %v210_v27, %v209_v26  ;;  %v39_v29 = vld [vmem:[%s1824_s0 + $0x10] sm:$0xff]  ;;  %v40_v30 = vld [vmem:[%s1824_s0 + $0x18] sm:$0xff]  ;;  %v41_v31 = vld [vmem:[%s1824_s0 + $0x20] sm:$0xff] }
  0x1b   :  { %1283 = vmatpush3.bf16.msra.mxu1 %v1594_v7  ;;  %1305 = vmatprep.subr.bf16.mxu0 %v1544_v0  ;;  %v42_v32 = vld [vmem:[%s1824_s0 + $0x28] sm:$0xff]  ;;  %v43_v33 = vld [vmem:[%s1824_s0 + $0x30] sm:$0xff]  ;;  %v44_v34 = vld [vmem:[%s1824_s0 + $0x38] sm:$0xff]  ;;  %s1547_s0 = smov [#allocation7]  }
  0x1c   :  { %1284 = vmatprep.subr.bf16.mxu1 %v1544_v0  ;;  %989 = vmatprep.mubr.msk.f32.mxu0 %vm53_vm2, %v39_v29  ;;  %v1699_v37 = vld [vmem:[%s1827_s3] ss:$0 sm:$0xff]  ;;  %s817_s3 = sshll.u32 %s1547_s0, 4  ;;  %s818_s3 = int_to_ptr.vmem [resolvable:$true] %s817_s3 }
  0x1d   :  { %990 = vmatmul.mubr.msk.f32.gmra.mrb[2].mxu0 %vm53_vm2, %v40_v30  ;;  %s1515_s21 = scalar_lea.vmem %s818_s3, 1024  ;;  %p1520_p9 = scmp.lt.s32.totalorder %s818_s3, %s818_s3 }
  0x1e   :  { %1307 = vmatpush3.bf16.msra.mxu0 %v1594_v7  ;;  %992 = vmatprep.mubr.msk.f32.mxu0 %vm53_vm2, %v41_v31  ;;  %p1516_p8 = scmp.ne.s32.totalorder %s818_s3, %s1515_s21  ;;  %p1521_p10 = scmp.lt.s32.totalorder %s1515_s21, %s1515_s21 }
  0x1f   :  { %1286 = vmatpush3.bf16.msra.mxu1 %v1608_v13  ;;  %1308 = vmatprep.subr.bf16.mxu0 %v1544_v0 }
  0x20   :  { %1287 = vmatprep.subr.bf16.mxu1 %v1544_v0  ;;  %p1522_p11 = por %p1521_p10, %p1520_p9 }
  0x21   :  { %993 = vmatmul.mubr.msk.f32.gmra.mrb[4].mxu0 %vm53_vm2, %v42_v32 }
  0x22   :  { %1310 = vmatpush3.bf16.msra.mxu0 %v1608_v13  ;;  %995 = vmatprep.mubr.msk.f32.mxu0 %vm53_vm2, %v43_v33  ;;  %p1523_p12 = pnand %p1522_p11, %p1516_p8 }
  0x23   :  { %1289 = vmatpush3.bf16.msra.mxu1 %v1616_v16  ;;  %1311 = vmatprep.subr.bf16.mxu0 %v1544_v0 }
  0x24   :  { %1290 = vmatprep.subr.bf16.mxu1 %v1544_v0 }
  0x25   :  { %996 = vmatmul.mubr.msk.f32.gmra.mrb[6].mxu0 %vm53_vm2, %v44_v34 }
  0x26   :  { %1313 = vmatpush3.bf16.msra.mxu0 %v1616_v16  ;;  %1065 = vmatprep.mubr.msk.f32.mxu0 %vm1545_vm0, %v1546_v1 }
  0x27   :  { %1292 = vmatpush3.bf16.msra.mxu1 %v1622_v19  ;;  %1314 = vmatprep.subr.bf16.mxu0 %v1544_v0 }
  0x28   :  { %1293 = vmatprep.subr.bf16.mxu1 %v1544_v0 }
  0x2a   :  { %1316 = vmatpush3.bf16.msra.mxu0 %v1622_v19 }
  0x2b   :  { %1295 = vmatpush3.bf16.msra.mxu1 %v1628_v22  ;;  %1317 = vmatprep.subr.bf16.mxu0 %v1544_v0 }
  0x2c   :  { %1296 = vmatprep.subr.bf16.mxu1 %v1544_v0 }
  0x2e   :  { %1319 = vmatpush3.bf16.msra.mxu0 %v1628_v22 }
  0x2f   :  { %1298 = vmatpush3.bf16.msra.mxu1 %v1634_v25  ;;  %1320 = vmatprep.subr.bf16.mxu0 %v1544_v0 }
  0x30   :  { %1299 = vmatprep.subr.bf16.mxu1 %v1544_v0 }
  0x32   :  { %1322 = vmatpush3.bf16.msra.mxu0 %v1634_v25 }
  0x33   :  { %1301 = vmatpush3.bf16.msra.mxu1 %v1640_v28  ;;  %1323 = vmatprep.subr.bf16.mxu0 %v1544_v0 }
  0x34   :  { %1326 = vmatprep.subr.bf16.mxu1 %v1544_v0 }
  0x36   :  { %1031 = vmatmul.mubr.f32.vlgmr.msra.gmra.mrb[0].mxu1 %v1546_v1  ;;  %1325 = vmatpush3.bf16.msra.mxu0 %v1640_v28 }
  0x37   :  { %1328 = vmatpush3.bf16.msra.mxu1 %v1591_v5  ;;  %1100 = vmatprep.mubr.msk.f32.mxu1 %vm1545_vm0, %v1546_v1 }
  0x38   :  { %1329 = vmatprep.subr.bf16.mxu1 %v1544_v0  ;;  %1350 = vmatprep.subr.bf16.mxu0 %v1544_v0 }
  0x3b   :  { %1331 = vmatpush3.bf16.msra.mxu1 %v1594_v7 }
  0x3c   :  { %1332 = vmatprep.subr.bf16.mxu1 %v1544_v0 }
  0x3f   :  { %1334 = vmatpush3.bf16.msra.mxu1 %v1608_v13 }
  0x40   :  { %1335 = vmatprep.subr.bf16.mxu1 %v1544_v0 }
  0x43   :  { %1337 = vmatpush3.bf16.msra.mxu1 %v1616_v16 }
  0x44   :  { %1338 = vmatprep.subr.bf16.mxu1 %v1544_v0 }
  0x47   :  { %1340 = vmatpush3.bf16.msra.mxu1 %v1622_v19 }
  0x48   :  { %1341 = vmatprep.subr.bf16.mxu1 %v1544_v0 }
  0x4b   :  { %1343 = vmatpush3.bf16.msra.mxu1 %v1628_v22 }
  0x4c   :  { %1344 = vmatprep.subr.bf16.mxu1 %v1544_v0 }
  0x4f   :  { %1346 = vmatpush3.bf16.msra.mxu1 %v1634_v25 }
  0x50   :  { %1347 = vmatprep.subr.bf16.mxu1 %v1544_v0 }
  0x53   :  { %1349 = vmatpush3.bf16.msra.mxu1 %v1640_v28 }
  0x54   :  { %1374 = vmatprep.subr.bf16.mxu1 %v1544_v0 }
  0xec   :  { %v988_v35 = vpop.f32.mrb[0].mxu0 }
  0xed   :  { %v148_v36 = vpop.f32.mrb[1].mxu0  ;;  %v154_v49 = vadd.f32 %v988_v35, %v1699_v37 }
  0xee   :  { %v149_v38 = vadd.f32 %v1699_v37, %v148_v36 }
  0xf0   :  { %v991_v43 = vpop.f32.mrb[2].mxu0 }
  0xf1   :  { %v158_v44 = vpop.f32.mrb[3].mxu0  ;;  %v164_v59 = vadd.f32 %v991_v43, %v1699_v37 }
  0xf2   :  { %v159_v54 = vadd.f32 %v1699_v37, %v158_v44 }
  0xf4   :  { %v1720_v45 = vpop.f32.mrb[4].mxu0 }
  0xf5   :  { %v1722_v46 = vpop.f32.mrb[5].mxu0 }
  0xf6   :  { %v169_v2 = vadd.f32 %v1699_v37, %v1722_v46 }
  0xf8   :  { %v1724_v47 = vpop.f32.mrb[6].mxu0 }
  0xf9   :  { %v1726_v48 = vpop.f32.mrb[7].mxu0  ;;  %v184_v15 = vadd.f32 %v1724_v47, %v1699_v37 }
  0xfa   :  { %v179_v11 = vadd.f32 %v1699_v37, %v1726_v48 }
 0x109   :  { %v279_v39 = vpop.f32.mrb[0].mxu1 }
 0x10a   :  { %v283_v40 = vadd.f32 %v279_v39, %v149_v38  ;;  %v1032_v41 = vpop.f32.mrb[1].mxu1 }
 0x10c   :  { %1477 = vtanh.f32 %v283_v40 }
 0x116   :  { %v1478_v42 = vpop.eup %1477 }
 0x117   :  { %285 = vst [vmem:[#allocation7] sm:$0xff] %v1478_v42  ;;  %1066 = vmatmul.mubr.f32.vlgmr.msra.gmra.mrb[8].mxu0 %v1478_v42 }
 0x118   :  { %1352 = vmatpush3.bf16.msra.mxu0 %v1591_v5  ;;  %1135 = vmatprep.mubr.msk.f32.mxu0 %vm1545_vm0, %v1546_v1 }
 0x119   :  { %1353 = vmatprep.subr.bf16.mxu0 %v1544_v0 }
 0x11c   :  { %1355 = vmatpush3.bf16.msra.mxu0 %v1594_v7 }
 0x11d   :  { %1356 = vmatprep.subr.bf16.mxu0 %v1544_v0 }
 0x120   :  { %1358 = vmatpush3.bf16.msra.mxu0 %v1608_v13 }
 0x121   :  { %1359 = vmatprep.subr.bf16.mxu0 %v1544_v0 }
 0x124   :  { %1361 = vmatpush3.bf16.msra.mxu0 %v1616_v16 }
 0x125   :  { %1362 = vmatprep.subr.bf16.mxu0 %v1544_v0 }
 0x128   :  { %1364 = vmatpush3.bf16.msra.mxu0 %v1622_v19 }
 0x129   :  { %1365 = vmatprep.subr.bf16.mxu0 %v1544_v0 }
 0x12c   :  { %1367 = vmatpush3.bf16.msra.mxu0 %v1628_v22 }
 0x12d   :  { %1368 = vmatprep.subr.bf16.mxu0 %v1544_v0 }
 0x130   :  { %1370 = vmatpush3.bf16.msra.mxu0 %v1634_v25 }
 0x131   :  { %1371 = vmatprep.subr.bf16.mxu0 %v1544_v0 }
 0x134   :  { %1373 = vmatpush3.bf16.msra.mxu0 %v1640_v28 }
 0x135   :  { %1398 = vmatprep.subr.bf16.mxu0 %v1544_v0 }
 0x1ea   :  { %v353_v50 = vpop.f32.mrb[8].mxu0 }
 0x1eb   :  { %v357_v51 = vadd.f32 %v353_v50, %v154_v49  ;;  %v1067_v52 = vpop.f32.mrb[9].mxu0 }
 0x1ed   :  { %1479 = vtanh.f32 %v357_v51 }
 0x1f7   :  { %v1480_v53 = vpop.eup %1479 }
 0x1f8   :  { %360 = vst [vmem:[#allocation7 + $0x8] sm:$0xff] %v1480_v53  ;;  %1101 = vmatmul.mubr.f32.vlgmr.msra.gmra.mrb[2].mxu1 %v1480_v53 }
 0x1f9   :  { %1376 = vmatpush3.bf16.msra.mxu1 %v1591_v5  ;;  %1170 = vmatprep.mubr.msk.f32.mxu1 %vm1545_vm0, %v1546_v1 }
 0x1fa   :  { %1377 = vmatprep.subr.bf16.mxu1 %v1544_v0 }
 0x1fd   :  { %1379 = vmatpush3.bf16.msra.mxu1 %v1594_v7 }
 0x1fe   :  { %1380 = vmatprep.subr.bf16.mxu1 %v1544_v0 }
 0x201   :  { %1382 = vmatpush3.bf16.msra.mxu1 %v1608_v13 }
 0x202   :  { %1383 = vmatprep.subr.bf16.mxu1 %v1544_v0 }
 0x205   :  { %1385 = vmatpush3.bf16.msra.mxu1 %v1616_v16 }
 0x206   :  { %1386 = vmatprep.subr.bf16.mxu1 %v1544_v0 }
 0x209   :  { %1388 = vmatpush3.bf16.msra.mxu1 %v1622_v19 }
 0x20a   :  { %1389 = vmatprep.subr.bf16.mxu1 %v1544_v0 }
 0x20d   :  { %1391 = vmatpush3.bf16.msra.mxu1 %v1628_v22 }
 0x20e   :  { %1392 = vmatprep.subr.bf16.mxu1 %v1544_v0 }
 0x211   :  { %1394 = vmatpush3.bf16.msra.mxu1 %v1634_v25 }
 0x212   :  { %1395 = vmatprep.subr.bf16.mxu1 %v1544_v0 }
 0x215   :  { %1397 = vmatpush3.bf16.msra.mxu1 %v1640_v28 }
 0x216   :  { %1422 = vmatprep.subr.bf16.mxu1 %v1544_v0 }
 0x2cb   :  { %v428_v55 = vpop.f32.mrb[2].mxu1 }
 0x2cc   :  { %v432_v56 = vadd.f32 %v428_v55, %v159_v54  ;;  %v1102_v57 = vpop.f32.mrb[3].mxu1 }
 0x2ce   :  { %1481 = vtanh.f32 %v432_v56 }
 0x2d8   :  { %v1482_v58 = vpop.eup %1481 }
 0x2d9   :  { %435 = vst [vmem:[#allocation7 + $0x10] sm:$0xff] %v1482_v58  ;;  %1136 = vmatmul.mubr.f32.vlgmr.msra.gmra.mrb[10].mxu0 %v1482_v58 }
 0x2da   :  { %1400 = vmatpush3.bf16.msra.mxu0 %v1591_v5  ;;  %1205 = vmatprep.mubr.msk.f32.mxu0 %vm1545_vm0, %v1546_v1 }
 0x2db   :  { %1401 = vmatprep.subr.bf16.mxu0 %v1544_v0 }
 0x2de   :  { %1403 = vmatpush3.bf16.msra.mxu0 %v1594_v7 }
 0x2df   :  { %1404 = vmatprep.subr.bf16.mxu0 %v1544_v0 }
 0x2e2   :  { %1406 = vmatpush3.bf16.msra.mxu0 %v1608_v13 }
 0x2e3   :  { %1407 = vmatprep.subr.bf16.mxu0 %v1544_v0 }
 0x2e6   :  { %1409 = vmatpush3.bf16.msra.mxu0 %v1616_v16 }
 0x2e7   :  { %1410 = vmatprep.subr.bf16.mxu0 %v1544_v0 }
 0x2ea   :  { %1412 = vmatpush3.bf16.msra.mxu0 %v1622_v19 }
 0x2eb   :  { %1413 = vmatprep.subr.bf16.mxu0 %v1544_v0 }
 0x2ee   :  { %1415 = vmatpush3.bf16.msra.mxu0 %v1628_v22 }
 0x2ef   :  { %1416 = vmatprep.subr.bf16.mxu0 %v1544_v0 }
 0x2f2   :  { %1418 = vmatpush3.bf16.msra.mxu0 %v1634_v25 }
 0x2f3   :  { %1419 = vmatprep.subr.bf16.mxu0 %v1544_v0 }
 0x2f6   :  { %1421 = vmatpush3.bf16.msra.mxu0 %v1640_v28 }
 0x2f7   :  { %1446 = vmatprep.subr.bf16.mxu0 %v1544_v0 }
 0x3ac   :  { %v503_v60 = vpop.f32.mrb[10].mxu0 }
 0x3ad   :  { %v507_v61 = vadd.f32 %v503_v60, %v164_v59  ;;  %v1137_v62 = vpop.f32.mrb[11].mxu0 }
 0x3af   :  { %1483 = vtanh.f32 %v507_v61 }
 0x3b9   :  { %v1484_v63 = vpop.eup %1483 }
 0x3ba   :  { %510 = vst [vmem:[#allocation7 + $0x18] sm:$0xff] %v1484_v63  ;;  %1171 = vmatmul.mubr.f32.vlgmr.msra.gmra.mrb[4].mxu1 %v1484_v63 }
 0x3bb   :  { %1424 = vmatpush3.bf16.msra.mxu1 %v1591_v5  ;;  %1240 = vmatprep.mubr.msk.f32.mxu1 %vm1545_vm0, %v1546_v1 }
 0x3bc   :  { %1425 = vmatprep.subr.bf16.mxu1 %v1544_v0 }
 0x3bf   :  { %1427 = vmatpush3.bf16.msra.mxu1 %v1594_v7 }
 0x3c0   :  { %1428 = vmatprep.subr.bf16.mxu1 %v1544_v0 }
 0x3c3   :  { %1430 = vmatpush3.bf16.msra.mxu1 %v1608_v13 }
 0x3c4   :  { %1431 = vmatprep.subr.bf16.mxu1 %v1544_v0 }
 0x3c7   :  { %1433 = vmatpush3.bf16.msra.mxu1 %v1616_v16 }
 0x3c8   :  { %1434 = vmatprep.subr.bf16.mxu1 %v1544_v0 }
 0x3cb   :  { %1436 = vmatpush3.bf16.msra.mxu1 %v1622_v19 }
 0x3cc   :  { %1437 = vmatprep.subr.bf16.mxu1 %v1544_v0 }
 0x3cf   :  { %1439 = vmatpush3.bf16.msra.mxu1 %v1628_v22 }
 0x3d0   :  { %1440 = vmatprep.subr.bf16.mxu1 %v1544_v0 }
 0x3d3   :  { %1442 = vmatpush3.bf16.msra.mxu1 %v1634_v25 }
 0x3d4   :  { %1443 = vmatprep.subr.bf16.mxu1 %v1544_v0 }
 0x3d7   :  { %1445 = vmatpush3.bf16.msra.mxu1 %v1640_v28 }
 0x48d   :  { %v578_v3 = vpop.f32.mrb[4].mxu1 }
 0x48e   :  { %v582_v4 = vadd.f32 %v578_v3, %v169_v2  ;;  %v1172_v6 = vpop.f32.mrb[5].mxu1 }
 0x490   :  { %1485 = vtanh.f32 %v582_v4 }
 0x49a   :  { %v1486_v8 = vpop.eup %1485 }
 0x49b   :  { %585 = vst [vmem:[#allocation7 + $0x20] sm:$0xff] %v1486_v8  ;;  %1206 = vmatmul.mubr.f32.vlgmr.msra.gmra.mrb[12].mxu0 %v1486_v8 }
 0x49c   :  { %1448 = vmatpush3.bf16.msra.mxu0 %v1591_v5  ;;  %1275 = vmatprep.mubr.msk.f32.mxu0 %vm1545_vm0, %v1546_v1  ;;  %v174_v1 = vadd.f32 %v1720_v45, %v1699_v37 }
 0x49d   :  { %1449 = vmatprep.subr.bf16.mxu0 %v1544_v0 }
 0x4a0   :  { %1451 = vmatpush3.bf16.msra.mxu0 %v1594_v7 }
 0x4a1   :  { %1452 = vmatprep.subr.bf16.mxu0 %v1544_v0 }
 0x4a4   :  { %1454 = vmatpush3.bf16.msra.mxu0 %v1608_v13 }
 0x4a5   :  { %1455 = vmatprep.subr.bf16.mxu0 %v1544_v0 }
 0x4a8   :  { %1457 = vmatpush3.bf16.msra.mxu0 %v1616_v16 }
 0x4a9   :  { %1458 = vmatprep.subr.bf16.mxu0 %v1544_v0 }
 0x4ac   :  { %1460 = vmatpush3.bf16.msra.mxu0 %v1622_v19 }
 0x4ad   :  { %1461 = vmatprep.subr.bf16.mxu0 %v1544_v0 }
 0x4b0   :  { %1463 = vmatpush3.bf16.msra.mxu0 %v1628_v22 }
 0x4b1   :  { %1464 = vmatprep.subr.bf16.mxu0 %v1544_v0 }
 0x4b4   :  { %1466 = vmatpush3.bf16.msra.mxu0 %v1634_v25 }
 0x4b5   :  { %1467 = vmatprep.subr.bf16.mxu0 %v1544_v0 }
 0x4b8   :  { %1469 = vmatpush3.bf16.msra.mxu0 %v1640_v28 }
 0x56e   :  { %v653_v5 = vpop.f32.mrb[12].mxu0 }
 0x56f   :  { %v657_v7 = vadd.f32 %v653_v5, %v174_v1  ;;  %v1207_v9 = vpop.f32.mrb[13].mxu0 }
 0x571   :  { %1487 = vtanh.f32 %v657_v7 }
 0x57b   :  { %v1488_v10 = vpop.eup %1487 }
 0x57c   :  { %660 = vst [vmem:[#allocation7 + $0x28] sm:$0xff] %v1488_v10  ;;  %1241 = vmatmul.mubr.f32.vlgmr.msra.gmra.mrb[6].mxu1 %v1488_v10 }
 0x64f   :  { %v728_v12 = vpop.f32.mrb[6].mxu1 }
 0x650   :  { %v732_v13 = vadd.f32 %v728_v12, %v179_v11  ;;  %v1242_v14 = vpop.f32.mrb[7].mxu1 }
 0x652   :  { %1489 = vtanh.f32 %v732_v13 }
 0x65c   :  { %v1490_v0 = vpop.eup %1489 }
 0x65d   :  { %735 = vst [vmem:[#allocation7 + $0x30] sm:$0xff] %v1490_v0  ;;  %1276 = vmatmul.mubr.f32.vlgmr.msra.gmra.mrb[14].mxu0 %v1490_v0 }
 0x730   :  { %v803_v16 = vpop.f32.mrb[14].mxu0 }
 0x731   :  { %v807_v17 = vadd.f32 %v803_v16, %v184_v15  ;;  %v1277_v18 = vpop.f32.mrb[15].mxu0 }
 0x733   :  { %1491 = vtanh.f32 %v807_v17 }
 0x73d   :  { %v1492_v19 = vpop.eup %1491 }
 0x73e   :  { %810 = vst [vmem:[#allocation7 + $0x38] sm:$0xff] %v1492_v19 }
 0x73f   :  { %1526 = shalt.err (!%p1523_p12)
}
 0x740   :  { %s1527_s24 = scalar_lea.hbm %s1828_s4, 1024 }
 0x741   :  { %p1528_p13 = scmp.ne.s32.totalorder %s1828_s4, %s1527_s24  ;;  %p1531_p0 = scmp.lt.u32.totalorder %s1527_s24, %s1828_s4 }
 0x743   :  { %p1533_p1 = pnand %p1531_p0, %p1528_p13 }
 0x745   :  { %1536 = shalt.err (!%p1533_p1)
}
 0x746   :  { %823 = dma.vmem_to_hbm [thread:$0]  %s818_s3, 1024, %s1828_s4, [#allocation6], %s1542_s25, %s1542_s25, %s1543_s26  }
 0x747   :  { %1539 = dma.done.wait [#allocation6], 1024  }
 0x748   :  { %1540 = vsyncadd [#allocation6], 4294966272 }
 0x749   :  { %827 = vsyncpa [#allocation5], 1 }
 0x74a   :  { %828 = vsyncpa [#allocation6], 1 }

</bundles_post_ra>
